<compile_context>
chip_gen: v5e
topology: v5e:2x2
jax: 0.10.0
libtpu: 0.0.40
codegen_flags: <defaults>
</compile_context>

<pallas_src>
import jax
import jax.numpy as jnp
from jax.experimental import pallas as pl
from jax.experimental.pallas import tpu as pltpu


def _round_up(x: int, m: int) -> int:
    return ((x + m - 1) // m) * m


def _embed_kernel(idx_ref, table_ref, out_ref):
    # idx_ref:   (TB, 1) int32   -- precomputed index (already +1 / masked to 0)
    # table_ref: (V, D)  float32 -- VMEM-resident across all grid steps
    # out_ref:   (TB, D) float32
    idx = idx_ref[...]                                                # (TB, 1)
    tb = idx.shape[0]
    V = table_ref.shape[0]

    # One-hot gather via MXU matmul (cheap while V is tiny).
    col = jax.lax.broadcasted_iota(jnp.int32, (tb, V), dimension=1)   # (TB, V)
    onehot = (col == idx).astype(table_ref.dtype)                     # (TB, V)

    out_ref[...] = jnp.dot(
        onehot, table_ref[...], preferred_element_type=jnp.float32
    ).astype(out_ref.dtype)


def discrete_action_embedding(action, embedding_table, masks=None, *, tile_b=512):
    """action: (B, 1) int, masks: (B, 1) bool or None, table: (V, D) f32 -> (B, D) f32."""
    B = action.shape[0]
    V, D = embedding_table.shape

    # Precompute the final index on the host/XLA side: idx = action + 1,
    # masked_fill(~mask, 0).  Single int32 input to the kernel.
    action_i32 = action.reshape(B, 1).astype(jnp.int32)
    if masks is None:
        idx = action_i32 + 1
    else:
        idx = jnp.where(masks.reshape(B, 1), action_i32 + 1, 0)
    idx = idx.astype(jnp.int32)

    # Tile the batch.  Tile must be a multiple of 8 (sublane rule); pad B up to
    # a tile multiple (padded rows index row 0 -> harmless, sliced off below).
    tb = max(8, min(_round_up(tile_b, 8), _round_up(B, 8)))
    Bp = _round_up(B, tb)
    if Bp != B:
        idx = jnp.pad(idx, ((0, Bp - B), (0, 0)))

    grid = (Bp // tb,)

    cost = pl.CostEstimate(
        flops=2 * Bp * V * D,
        transcendentals=0,
        bytes_accessed=Bp * D * 4 + V * D * 4 + Bp * 4,
    )

    out = pl.pallas_call(
        _embed_kernel,
        out_shape=jax.ShapeDtypeStruct((Bp, D), jnp.float32),
        grid=grid,
        in_specs=[
            pl.BlockSpec((tb, 1), lambda i: (i, 0)),     # per-tile indices
            pl.BlockSpec((V, D), lambda i: (0, 0)),      # table: resident, not re-fetched
        ],
        out_specs=pl.BlockSpec((tb, D), lambda i: (i, 0)),
        compiler_params=pltpu.CompilerParams(
            dimension_semantics=("parallel",),           # shards over 2 TCs on v7x
        ),
        cost_estimate=cost,
    )(idx, embedding_table)

    return out[:B]


if __name__ == "__main__":
    key = jax.random.PRNGKey(0)
    k_tab, k_act, k_msk, k_act2 = jax.random.split(key, 4)

    n_actions_space = 7          # gym.spaces.Discrete(7)
    dim_per_action = 128
    vocab = n_actions_space + 1  # +1 for start token (entry 0)
    batch = 8

    # Deterministic "parameters" (nn.Embedding weight), like N(0,1) init.
    table = jax.random.normal(k_tab, (vocab, dim_per_action), dtype=jnp.float32)

    # Example inputs.
    action = jax.random.randint(k_act, (batch, 1), 0, n_actions_space, dtype=jnp.int32)
    masks = jax.random.bernoulli(k_msk, 0.7, (batch, 1))

    out = discrete_action_embedding(action, table, masks)
    out = jax.block_until_ready(out)

    # Reference (pure JAX) check of the forward semantics.
    idx_ref = jnp.where(masks, action.astype(jnp.int32) + 1, 0)[:, 0]
    ref = jnp.take(table, idx_ref, axis=0)
    assert out.shape == (batch, dim_per_action)
    assert jnp.allclose(out, ref, atol=1e-5, rtol=1e-5)

    # masks=None path.
    out_nomask = jax.block_until_ready(discrete_action_embedding(action, table, None))
    ref_nomask = jnp.take(table, action[:, 0].astype(jnp.int32) + 1, axis=0)
    assert jnp.allclose(out_nomask, ref_nomask, atol=1e-5, rtol=1e-5)

    # Non-multiple-of-tile batch to exercise the padding path.
    batch2 = 13
    action2 = jax.random.randint(k_act2, (batch2, 1), 0, n_actions_space, dtype=jnp.int32)
    out2 = jax.block_until_ready(discrete_action_embedding(action2, table, None, tile_b=8))
    ref2 = jnp.take(table, action2[:, 0].astype(jnp.int32) + 1, axis=0)
    assert out2.shape == (batch2, dim_per_action)
    assert jnp.allclose(out2, ref2, atol=1e-5, rtol=1e-5)

    print("KERNEL_OK")
</pallas_src>

<mosaic_0001>
module attributes {stable_mosaic.version = 11 : i64} {
  func.func @_embed_kernel(%arg0: i32, %arg1: memref<8x1xi32, #tpu.memory_space<vmem>>, %arg2: memref<8x128xf32, #tpu.memory_space<vmem>>, %arg3: memref<8x128xf32, #tpu.memory_space<vmem>>) attributes {dimension_semantics = [#tpu.dimension_semantics<parallel>], iteration_bounds = array<i64: 1>, scalar_prefetch = 0 : i64, scratch_operands = 0 : i64, tpu.core_type = #tpu.core_type<tc>, window_params = [{transform_indices = @transform_0, window_bounds = array<i64: 8, 1>}, {pipeline_mode = #tpu.pipeline_mode<synchronous>, transform_indices = @transform_1, window_bounds = array<i64: 8, 128>}, {transform_indices = @transform_2, window_bounds = array<i64: 8, 128>}]} {
    %c0 = arith.constant 0 : index
    %c0_0 = arith.constant 0 : index
    %0 = vector.load %arg1[%c0, %c0_0] : memref<8x1xi32, #tpu.memory_space<vmem>>, vector<8x1xi32>
    %1 = tpu.iota {dimensions = array<i32: 1>} : vector<8x8xi32>
    %2 = vector.broadcast %0 : vector<8x1xi32> to vector<8x8xi32>
    %3 = arith.cmpi eq, %1, %2 : vector<8x8xi32>
    %4 = arith.extui %3 : vector<8x8xi1> to vector<8x8xi32>
    %5 = arith.sitofp %4 : vector<8x8xi32> to vector<8x8xf32>
    %c0_1 = arith.constant 0 : index
    %c0_2 = arith.constant 0 : index
    %6 = vector.load %arg2[%c0_1, %c0_2] : memref<8x128xf32, #tpu.memory_space<vmem>>, vector<8x128xf32>
    %cst = arith.constant dense<0.000000e+00> : vector<8x128xf32>
    %7 = tpu.matmul %5, %6, %cst {dimension_numbers = #tpu.dot_dimension_numbers<[1], [0], [0], [1], [0, 0, 1, 1], [], []>} : vector<8x8xf32>, vector<8x128xf32>, vector<8x128xf32> -> vector<8x128xf32>
    %c0_3 = arith.constant 0 : index
    %c0_4 = arith.constant 0 : index
    %8 = vector.load %arg3[%c0_3, %c0_4] : memref<8x128xf32, #tpu.memory_space<vmem>>, vector<8x128xf32>
    tpu.vector_store %arg3[%c0_3, %c0_4], %7 {strides = array<i32>} : memref<8x128xf32, #tpu.memory_space<vmem>>, vector<8x128xf32>,
    return
  }
  func.func @transform_0(%arg0: i32) -> (i32, i32) {
    %c0_i32 = arith.constant 0 : i32
    %c0_i32_0 = arith.constant 0 : i32
    return %arg0, %c0_i32 : i32, i32
  }
  func.func @transform_1(%arg0: i32) -> (i32, i32) {
    %c0_i32 = arith.constant 0 : i32
    %c0_i32_0 = arith.constant 0 : i32
    %c0_i32_1 = arith.constant 0 : i32
    return %c0_i32, %c0_i32_0 : i32, i32
  }
  func.func @transform_2(%arg0: i32) -> (i32, i32) {
    %c0_i32 = arith.constant 0 : i32
    %c0_i32_0 = arith.constant 0 : i32
    return %arg0, %c0_i32 : i32, i32
  }
}

</mosaic_0001>

<bundles_post_ra>
// kernel: tpu_custom_call.1
= control target key start
LH: loop header
LB: loop body
LE: loop exit
PB: predicated region body
PF: predicated region fallthrough
CT: control target
= control target key end

     0   :  { %s122_s0 = inlined_call_operand.vmem [shape: s32[8,1], index: 0, kind: input, shape index: {}]   ;;  %s123_s1 = inlined_call_operand.vmem [shape: f32[8,128], index: 1, kind: input, shape index: {}]   ;;  %s124_s2 = inlined_call_operand.hbm [shape: f32[8,128], index: 2, kind: output, shape index: {}]  }
   0x1   :  { %v12_v0 = vld [vmem:[%s122_s0] sm:$0xff] }
   0x2   :  { %7 = vsyncpa [#allocation3], 0  ;;  %v95_v1 = vmov 0   ;;  %v21_v2 = vld [vmem:[%s123_s1] sm:$0xff]  ;;  %v13_v3 = vlaneseq  ;;  %vm22_vm0 = vcmask 64512   ;;  %v96_v6 = vmov 0.0  }
   0x3   :  { %68 = vset.pattern.permute.xlu0 %v95_v1  ;;  %41 = vmatpush.msra.mxu0 %v21_v2  ;;  %s97_s13 = smov [#allocation2]   ;;  %s54_s16 = sshll.u32 %s124_s2, 4  ;;  %s55_s16 = int_to_ptr.hbm [resolvable:$true] %s54_s16 }
   0x4   :  { %16 = vperm.xlu0 %68, %v12_v0   ;;  %v14_v4 = vand.u32 127, %v13_v3  ;;  %s52_s14 = sshll.u32 %s97_s13, 4  ;;  %s53_s14 = int_to_ptr.vmem [resolvable:$true] %s52_s14 }
  0x76   :  { %v17_v5 = vpop.permute.xlu0 %16 }
  0x77   :  { %vm18_vm1 = vcmp.eq.s32.totalorder %v14_v4, %v17_v5 }
  0x78   :  { %v63_v7 = vsel %vm18_vm1, 1.0, %v96_v6 }
  0x79   :  { %64 = vmatmul.msk.f32.vlgmr.msra.gmra.mxu0 %vm22_vm0, %v63_v7 }
  0xf6   :  { %v43_v8 = vpop.f32.mrf.mxu0 }
  0xf7   :  { %46 = vst [vmem:[#allocation2] sm:$0xff] %v43_v8 }
  0xf8   :  { %57 = dma.vmem_to_hbm [thread:$0]  %s53_s14, 128, %s55_s16, [#allocation3]  }
  0xf9   :  { %93 = dma.done.wait [#allocation3], 128  }
  0xfa   :  { %94 = vsyncadd [#allocation3], 4294967168 }
  0xfb   :  { %62 = vsyncpa [#allocation3], 1 }

</bundles_post_ra>
